<compile_context>
chip_gen: v7x
topology: tpu7x:2x2x1
jax: 0.10.0
libtpu: 0.0.40
codegen_flags: <defaults>
</compile_context>

<pallas_src>
import jax
import jax.numpy as jnp
from jax import lax
from jax.experimental import pallas as pl
from jax.experimental.pallas import tpu as pltpu

KSIZE = 7  # kernel_size (3 or 7 both supported; padding = KSIZE // 2)


def _vmem_budget_bytes():
    """Per-generation VMEM budget (bytes) for all double-buffered blocks."""
    mib = 1024 * 1024
    cap = 0
    try:
        cap = pltpu.get_tpu_info().vmem_capacity_bytes
    except Exception:
        cap = 0
    kind = ""
    try:
        kind = jax.devices()[0].device_kind.lower()
    except Exception:
        kind = ""
    if "v5" in kind:                      # v5e: smallest scoped VMEM / slowest MXU
        return 12 * mib
    if cap and cap <= 64 * mib:           # v7x-class: 64 MiB physical per TC
        return 24 * mib
    return 48 * mib                       # v6e-class: 128 MiB physical


def _conv_as_matmul_weights(w, H, W, HWp):
    """Fold the 2->1 KxK conv (zero padding K//2, no bias) into one bf16 matmul.

    Returns M of shape (2*HWp, HWp) such that for feat = [avg | mx] (lane-padded
    to HWp per half), feat @ M equals nn.Conv2d(2, 1, K, padding=K//2,
    bias=False) flattened over the spatial axis (padded columns are zero).
    """
    K = w.shape[-1]
    P = K // 2
    HW = H * W
    wc = w.reshape(2, K, K).astype(jnp.float32)

    dy = jnp.arange(H)[:, None] - jnp.arange(H)[None, :] + P   # (H_in, H_out)
    dx = jnp.arange(W)[:, None] - jnp.arange(W)[None, :] + P   # (W_in, W_out)
    vy = (dy >= 0) & (dy < K)
    vx = (dx >= 0) & (dx < K)
    dyc = jnp.clip(dy, 0, K - 1)
    dxc = jnp.clip(dx, 0, K - 1)

    # TODO(synk): for large H*W replace this dense block-Toeplitz matrix
    # (O(HW^2) memory/FLOPs and an O(HW^2) trace-time intermediate) with K
    # per-kernel-row banded Toeplitz matmuls over row-shifted inputs.
    m5 = wc[:, dyc[:, :, None, None], dxc[None, None, :, :]]   # (2, H, H, W, W)
    m5 = jnp.where((vy[:, :, None, None] & vx[None, None, :, :])[None], m5, 0.0)
    m = m5.transpose(0, 1, 3, 2, 4).reshape(2, HW, HW)         # (2, HW, HW)

    # Fused + lane-padded layout: rows [0, HW) carry the avg block, rows
    # [HWp, HWp + HW) the max block; padded rows/cols stay zero so the padded
    # spatial columns of x contribute nothing.
    mf = jnp.zeros((2 * HWp, HWp), jnp.float32)
    mf = mf.at[:HW, :HW].set(m[0])
    mf = mf.at[HWp:HWp + HW, :HW].set(m[1])
    return mf.astype(jnp.bfloat16)


def spatial_attention_kernel(x_ref, m_ref, o_ref):
    # x_ref: (C, bt, HWp) f32   -- channel-major batch tile, lane-dense spatial
    # m_ref: (2*HWp, tn) bf16   -- column slice of the fused conv matrix
    # o_ref: (bt, tn)    f32    -- lane-dense output tile
    C = x_ref.shape[0]

    # Fused single pass over C: running sum + running max, bounded live set.
    x0 = x_ref[0]

    def body(c, carry):
        s, mx = carry
        xc = x_ref[c]
        return s + xc, jnp.maximum(mx, xc)

    s, mx = lax.fori_loop(1, C, body, (x0, x0), unroll=min(8, max(C - 1, 1)))
    avg = s * (1.0 / C)

    # KxK zero-padded conv (2 -> 1): ONE bf16 MXU matmul with f32 accumulation.
    feat = jnp.concatenate([avg, mx], axis=-1).astype(jnp.bfloat16)  # (bt, 2*HWp)
    y = jnp.dot(feat, m_ref[...], preferred_element_type=jnp.float32)
    o_ref[...] = jax.nn.sigmoid(y)


def spatial_attention(x, w, *, vmem_budget_bytes=None):
    """x: (B, C, H, W) f32; w: (1, 2, K, K) f32 (OIHW, bias-free)."""
    B, C, H, W = x.shape
    HW = H * W
    HWp = 128 * ((HW + 127) // 128)                     # lane-dense spatial axis

    # Channel-major, lane-dense, zero-padded input: (C, B, HWp).
    x_c = jnp.transpose(x.reshape(B, C, HW), (1, 0, 2)).astype(jnp.float32)
    if HWp != HW:
        x_c = jnp.pad(x_c, ((0, 0), (0, 0), (0, HWp - HW)))

    m = _conv_as_matmul_weights(w, H, W, HWp)           # (2*HWp, HWp) bf16

    budget = _vmem_budget_bytes() if vmem_budget_bytes is None else vmem_budget_bytes

    # ---- tile sizing -------------------------------------------------------
    # Column tiling of the fused weight: keep the DOUBLE-BUFFERED bf16 M slice
    # under ~half the budget while tn stays a multiple of 128.
    def m_slice_bytes(nt_):
        return 2 * (2 * HWp) * (HWp // nt_) * 2         # 2x: pipeline double-buffer

    nt = 1
    while m_slice_bytes(nt) > budget // 2 and HWp % (nt * 256) == 0:
        nt *= 2

    # Batch tiling: bounded by the reduction's live vreg set (s, mx, xc in f32
    # ~ half the 256 KiB vreg file) and by the double-buffered x / out blocks
    # fitting next to the weight slice.  Extra grid steps are cheap.
    row_cap = max(1, (128 * 1024) // (3 * HWp * 4))
    per_row = 2 * C * HWp * 4 + 2 * (HWp // nt) * 4
    row_cap = min(row_cap, max(1, (budget - m_slice_bytes(nt)) // per_row))
    if B <= 8 or B <= row_cap:
        bt = B                                          # block dim == full dim
    else:
        bt = max(8, (min(B, row_cap) // 8) * 8)         # sublane-aligned tiles
    nb = pl.cdiv(B, bt)

    # v7x megacore: guarantee >=2 grid steps by splitting output columns.
    if nb * nt == 1 and HWp % 256 == 0:
        nt = 2
    tn = HWp // nt

    out = pl.pallas_call(
        spatial_attention_kernel,
        out_shape=jax.ShapeDtypeStruct((B, HWp), jnp.float32),
        grid=(nb, nt),
        in_specs=[
            pl.BlockSpec((C, bt, HWp), lambda b, j: (0, b, 0)),  # channel-major x tile
            pl.BlockSpec((2 * HWp, tn), lambda b, j: (0, j)),    # column slice of M
        ],
        out_specs=pl.BlockSpec((bt, tn), lambda b, j: (b, j)),
        compiler_params=pltpu.CompilerParams(
            dimension_semantics=("parallel", "parallel"),        # shard over v7x's 2 TCs
            vmem_limit_bytes=int(budget + 8 * 1024 * 1024)),
    )(x_c, m)
    return out[:, :HW].reshape(B, 1, H, W)


def _reference(x, w):
    avg = jnp.mean(x, axis=1, keepdims=True)
    mx = jnp.max(x, axis=1, keepdims=True)
    cat = jnp.concatenate([avg, mx], axis=1)
    P = w.shape[-1] // 2
    y = lax.conv_general_dilated(
        cat, w, window_strides=(1, 1), padding=((P, P), (P, P)),
        dimension_numbers=("NCHW", "OIHW", "NCHW"),
        precision=lax.Precision.HIGHEST)
    return jax.nn.sigmoid(y)


if __name__ == "__main__":
    key = jax.random.PRNGKey(0)
    kx, kw = jax.random.split(key)

    B, C, H, W = 2, 4, 16, 16
    x = jax.random.normal(kx, (B, C, H, W), dtype=jnp.float32)

    # Deterministic synthetic weight (shape of nn.Conv2d(2, 1, 7, bias=False)),
    # kaiming-uniform-like bound as in PyTorch default init.
    fan_in = 2 * KSIZE * KSIZE
    bound = 1.0 / (fan_in ** 0.5)
    w = jax.random.uniform(kw, (1, 2, KSIZE, KSIZE), dtype=jnp.float32,
                           minval=-bound, maxval=bound)

    out = spatial_attention(x, w)
    out = jax.block_until_ready(out)

    ref = _reference(x, w)
    assert out.shape == (B, 1, H, W)
    # Tolerance covers bf16 quantization of the conv operands (only 49 nonzero
    # taps per output column, error further compressed by sigmoid); real bugs
    # produce errors >> 1e-2.
    assert jnp.allclose(out, ref, atol=3e-3, rtol=3e-3), "mismatch vs JAX reference"

    print("KERNEL_OK")
</pallas_src>

<mosaic_0001>
module attributes {stable_mosaic.version = 11 : i64} {
  func.func @spatial_attention_kernel(%arg0: i32, %arg1: i32, %arg2: memref<4x2x256xf32, #tpu.memory_space<vmem>>, %arg3: memref<512x128xbf16, #tpu.memory_space<vmem>>, %arg4: memref<2x128xf32, #tpu.memory_space<vmem>>) attributes {dimension_semantics = [#tpu.dimension_semantics<parallel>, #tpu.dimension_semantics<parallel>], iteration_bounds = array<i64: 1, 2>, scalar_prefetch = 0 : i64, scratch_operands = 0 : i64, tpu.core_type = #tpu.core_type<tc>, window_params = [{transform_indices = @transform_0, window_bounds = array<i64: 4, 2, 256>}, {transform_indices = @transform_1, window_bounds = array<i64: 512, 128>}, {transform_indices = @transform_2, window_bounds = array<i64: 2, 128>}]} {
    %c0 = arith.constant 0 : index
    %c0_0 = arith.constant 0 : index
    %c0_1 = arith.constant 0 : index
    %0 = vector.load %arg2[%c0, %c0_0, %c0_1] : memref<4x2x256xf32, #tpu.memory_space<vmem>>, vector<1x2x256xf32>
    %1 = vector.shape_cast %0 : vector<1x2x256xf32> to vector<2x256xf32>
    %c1_i32 = arith.constant 1 : i32
    %2 = arith.index_cast %c1_i32 : i32 to index
    %c0_2 = arith.constant 0 : index
    %c0_3 = arith.constant 0 : index
    %3 = vector.load %arg2[%2, %c0_2, %c0_3] : memref<4x2x256xf32, #tpu.memory_space<vmem>>, vector<1x2x256xf32>
    %4 = vector.shape_cast %3 : vector<1x2x256xf32> to vector<2x256xf32>
    %5 = arith.addf %1, %4 : vector<2x256xf32>
    %6 = arith.maximumf %1, %4 : vector<2x256xf32>
    %c2_i32 = arith.constant 2 : i32
    %7 = arith.index_cast %c2_i32 : i32 to index
    %c0_4 = arith.constant 0 : index
    %c0_5 = arith.constant 0 : index
    %8 = vector.load %arg2[%7, %c0_4, %c0_5] : memref<4x2x256xf32, #tpu.memory_space<vmem>>, vector<1x2x256xf32>
    %9 = vector.shape_cast %8 : vector<1x2x256xf32> to vector<2x256xf32>
    %10 = arith.addf %5, %9 : vector<2x256xf32>
    %11 = arith.maximumf %6, %9 : vector<2x256xf32>
    %c3_i32 = arith.constant 3 : i32
    %12 = arith.index_cast %c3_i32 : i32 to index
    %c0_6 = arith.constant 0 : index
    %c0_7 = arith.constant 0 : index
    %13 = vector.load %arg2[%12, %c0_6, %c0_7] : memref<4x2x256xf32, #tpu.memory_space<vmem>>, vector<1x2x256xf32>
    %14 = vector.shape_cast %13 : vector<1x2x256xf32> to vector<2x256xf32>
    %15 = arith.addf %10, %14 : vector<2x256xf32>
    %16 = arith.maximumf %11, %14 : vector<2x256xf32>
    %c3_i32_8 = arith.constant 3 : i32
    %cst = arith.constant 2.500000e-01 : f32
    %17 = vector.broadcast %cst : f32 to vector<2x256xf32>
    %18 = arith.mulf %15, %17 : vector<2x256xf32>
    %19 = tpu.concatenate %18, %16 in 1 : vector<2x256xf32>, vector<2x256xf32> -> vector<2x512xf32>
    %20 = arith.truncf %19 : vector<2x512xf32> to vector<2x512xbf16>
    %c0_9 = arith.constant 0 : index
    %c0_10 = arith.constant 0 : index
    %21 = vector.load %arg3[%c0_9, %c0_10] : memref<512x128xbf16, #tpu.memory_space<vmem>>, vector<512x128xbf16>
    %cst_11 = arith.constant dense<0.000000e+00> : vector<2x128xf32>
    %22 = tpu.matmul %20, %21, %cst_11 {dimension_numbers = #tpu.dot_dimension_numbers<[1], [0], [0], [1], [0, 0, 1, 1], [], []>} : vector<2x512xbf16>, vector<512x128xbf16>, vector<2x128xf32> -> vector<2x128xf32>
    %23 = arith.negf %22 : vector<2x128xf32>
    %24 = math.exp %23 : vector<2x128xf32>
    %cst_12 = arith.constant 1.000000e+00 : f32
    %25 = vector.broadcast %cst_12 : f32 to vector<2x128xf32>
    %26 = arith.addf %25, %24 : vector<2x128xf32>
    %27 = arith.divf %25, %26 : vector<2x128xf32>
    %c0_13 = arith.constant 0 : index
    %c0_14 = arith.constant 0 : index
    %28 = vector.load %arg4[%c0_13, %c0_14] : memref<2x128xf32, #tpu.memory_space<vmem>>, vector<2x128xf32>
    tpu.vector_store %arg4[%c0_13, %c0_14], %27 {strides = array<i32>} : memref<2x128xf32, #tpu.memory_space<vmem>>, vector<2x128xf32>,
    return
  }
  func.func @transform_0(%arg0: i32, %arg1: i32) -> (i32, i32, i32) {
    %c0_i32 = arith.constant 0 : i32
    %c0_i32_0 = arith.constant 0 : i32
    %c0_i32_1 = arith.constant 0 : i32
    return %c0_i32, %arg0, %c0_i32_0 : i32, i32, i32
  }
  func.func @transform_1(%arg0: i32, %arg1: i32) -> (i32, i32) {
    %c0_i32 = arith.constant 0 : i32
    %c0_i32_0 = arith.constant 0 : i32
    return %c0_i32, %arg1 : i32, i32
  }
  func.func @transform_2(%arg0: i32, %arg1: i32) -> (i32, i32) {
    %c0_i32 = arith.constant 0 : i32
    return %arg0, %arg1 : i32, i32
  }
}

</mosaic_0001>

<bundles_post_ra>
// kernel: tpu_custom_call.1
= control target key start
LH: loop header
LB: loop body
LE: loop exit
PB: predicated region body
PF: predicated region fallthrough
CT: control target
= control target key end

     0   :  { %7 = vsyncpa [#allocation3], 0  ;;  %s1323_s0 = inlined_call_operand.hbm [shape: f32[4,2,256], index: 0, kind: input, shape index: {}]   ;;  %s1324_s1 = inlined_call_operand.hbm [shape: bf16[512,256], index: 1, kind: input, shape index: {}]   ;;  %s1325_s2 = inlined_call_operand.hbm [shape: f32[2,256], index: 2, kind: output, shape index: {}]  }
   0x1   :  { %8 = vsyncpa [#allocation6], 0 }
   0x2   :  { %10 = vsyncpa [#allocation6 + $0x1], 0 }
   0x3   :  { %11 = vsyncpa [#allocation4], 0 }
   0x4   :  { %13 = vsyncpa [#allocation4 + $0x1], 0  ;;  %s1065_s9 = smov 0   ;;  %s1067_s10 = smov 0  }
   0x5   :  { %s1069_s11 = smov 0   ;;  %s1071_s12 = smov 0  }
   0x6   :  { %s1073_s13 = smov 0   ;;  %s1075_s14 = smov 0  }
   0x7 LB: > { %s692_s15 = sadd.s32 4294967295, %s1041_s14   ;;  %s693_s16 = sadd.s32 4294967294, %s1041_s14   ;;  %s1041_s14 = sphi %s1075_s14, %s19_s14   ;;  %s1037_s13 = sphi %s1073_s13, %s1351_s13   ;;  %s1033_s12 = sphi %s1071_s12, %s1350_s12   ;;  %s1029_s11 = sphi %s1069_s11, %s1349_s11   ;;  %s1025_s10 = sphi %s1067_s10, %s1348_s10   ;;  %s1021_s9 = sphi %s1065_s9, %s1347_s9  }
   0x8   : > { %p71_p0 = scmp.ne.s32.totalorder %s1029_s11, %s1025_s10  ;;  %p72_p1 = scmp.eq.s32.totalorder %s1041_s14, 0 }
   0x9   : > { %p77_p2 = scmp.ne.s32.totalorder %s1025_s10, %s1021_s9  ;;  %p1102_p3 = scmp.eq.s32.totalorder %s692_s15, 0 }
   0xa   : > { %p1106_p4 = por %p72_p1, %p71_p0  ;;  %p103_p5 = scmp.eq.s32.totalorder %s692_s15, 1 }
   0xb   : > { %s1332_s17 = scalar_select %p1102_p3, 1, 0 }
   0xc   : > { %p1112_p6 = por %p1102_p3, %p77_p2  ;;  %p109_p7 = scmp.eq.s32.totalorder %s693_s16, 1 }
   0xd   : > { %p1116_p8 = por %p103_p5, %p71_p0  ;;  %p694_p9 = scmp.ge.s32.totalorder %s1041_s14, 1 }
   0xe   : > { %s1334_s19 = scalar_select %p1112_p6, 1, 0 }
   0xf   : > { %s1335_s20 = scalar_select %p1116_p8, 1, 0 }
  0x10   : > { %p1121_p10 = por %p109_p7, %p77_p2  ;;  %p116_p11 = scmp.lt.s32.totalorder %s1041_s14, 3 }
  0x11   : > { %s1043_s23 = smov [#allocation2]   ;;  %p805_p1 = scmp.lt.s32.totalorder %s1041_s14, 2 }
  0x12   : > { %s1336_s21 = scalar_select %p1121_p10, 1, 0 }
  0x13   : > { %p1126_p12 = pnand %p694_p9, %p116_p11  ;;  %s131_s24 = sshll.u32 %s1043_s23, 4  ;;  %s1130_s24 = int_to_ptr.vmem [resolvable:$true] %s131_s24 }
  0x14   : > { %p1144_p2 = pnand %p805_p1, %p1106_p4  ;;  %s28_s27 = sadd.s32 1, %s1037_s13 }
  0x15   : > { %s1337_s22 = scalar_select %p1126_p12, 1, 0 }
  0x16   : > { %p792_p13 = pneg %p1126_p12  ;;  %s897_s30 = scalar_lea.hbm %s1323_s0, 256 }
  0x17   : > { %s1339_s26 = scalar_select %p1144_p2, 1, 0 }
  0x18   : > { %p1138_p5 = pnand %p792_p13, %p1102_p3  ;;  %p898_p7 = scmp.ne.s32.totalorder %s1323_s0, %s897_s30 }
  0x19   : > { %p904_p4 = scmp.lt.u32.totalorder %s897_s30, %s1323_s0 }
  0x1a   : > { %p899_p9 = pneg %p1138_p5 }
  0x1c   : > { %p900_p11 = pnand %p899_p9, %p898_p7 }
  0x1e   : > { %p901_p13 = pneg %p900_p11 }
  0x20   : > { %p906_p1 = pnand %p904_p4, %p901_p13 }
  0x22   : > { %909 = shalt.err (!%p906_p1)
}
  0x23   : > { %s910_s7 = scalar_lea.vmem %s1130_s24, 256  ;;  %p918_p6 = scmp.lt.s32.totalorder %s1130_s24, %s1130_s24 }
  0x24   : > { %p911_p0 = scmp.ne.s32.totalorder %s1130_s24, %s910_s7  ;;  %p919_p3 = scmp.lt.s32.totalorder %s910_s7, %s910_s7 }
  0x26   : > { %p913_p10 = pnand %p911_p0, %p899_p9  ;;  %p920_p12 = por %p919_p3, %p918_p6 }
  0x28   : > { %p914_p8 = pneg %p913_p10 }
  0x2a   : > { %p921_p2 = pnand %p920_p12, %p914_p8 }
  0x2c   : > { %924 = shalt.err (!%p921_p2)
}
  0x2d   : > { %s1044_s8 = smov 64   ;;  %s1045_s15 = smov 4  }
  0x2e   : > { %795 = dma.hbm_to_vmem [thread:$0]  (!%p1138_p5), %s1323_s0, 256, %s1130_s24, [#allocation3], %s1044_s8, %s1044_s8, %s1045_s15  }
  0x2f   : > { %p29_p3 = scmp.ge.s32.totalorder %s28_s27, 2  ;;  %s64_s23 = sadd.s32 1, %s1029_s11 }
  0x30   : > { %s145_s28 = sand.u32 1, %s1029_s11   ;;  %s698_s3 = sshll.u32 %s1037_s13, 6 }
  0x31   : > { %s1353_s27 = smov (%p29_p3, %s28_s27), 0  ;;  %s697_s29 = sshll.u32 %s145_s28, 8 }
  0x32   : > { %s61_s30 = ssub.s32 %s1037_s13, %s1353_s27  ;;  %s1183_s5 = scalar_lea.hbm %s1324_s1, %s698_s3 }
  0x33   : > { %p62_p6 = scmp.eq.s32.totalorder %s61_s30, 0  ;;  %s149_s24 = scalar_lea.vmem [#allocation5], %s697_s29 }
  0x34   : > { %s155_s6 = sshll.u32 %s149_s24, 4  ;;  %s1190_s16 = scalar_lea.sflag [#allocation6], %s145_s28  ;;  %s1188_s6 = int_to_ptr.vmem [resolvable:$true] %s155_s6 }
  0x35   : > { %s1186_s7 = scalar_select %p62_p6, %s1029_s11, %s64_s23  }
  0x36   : > { %s925_s18 = scalar_lea.hbm %s1183_s5, 4096  ;;  %p1340_p10 = scmp.ne.s32.totalorder %s1339_s26, 0 }
  0x37   : > { %p926_p8 = scmp.ne.s32.totalorder %s1183_s5, %s925_s18  ;;  %s930_s25 = scalar_lea.hbm %s1324_s1, 8192 }
  0x38   : > { %p927_p12 = pneg %p1340_p10  ;;  %p931_p2 = scmp.lt.u32.totalorder %s1183_s5, %s1324_s1 }
  0x39   : > { %p932_p7 = scmp.lt.u32.totalorder %s930_s25, %s925_s18  ;;  %p934_p11 = scmp.lt.u32.totalorder %s925_s18, %s1183_s5 }
  0x3a   : > { %p928_p0 = pnand %p927_p12, %p926_p8 }
  0x3b   : > { %p933_p9 = por %p932_p7, %p931_p2 }
  0x3c   : > { %p929_p5 = pneg %p928_p0 }
  0x3d   : > { %p935_p13 = por %p934_p11, %p933_p9 }
  0x3f   : > { %p936_p4 = pnand %p935_p13, %p929_p5 }
  0x41   : > { %939 = shalt.err (!%p936_p4)
}
  0x42   : > { %s940_s23 = scalar_lea.vmem %s1188_s6, 4096  ;;  %s1046_s28 = smov [#allocation5]  }
  0x43   : > { %p941_p1 = scmp.ne.s32.totalorder %s1188_s6, %s940_s23  ;;  %s945_s24 = sshll.u32 %s1046_s28, 4  ;;  %s946_s24 = int_to_ptr.vmem [resolvable:$false] %s945_s24 }
  0x44   : > { %s947_s30 = scalar_lea.vmem %s946_s24, 8192  ;;  %p948_p8 = scmp.lt.s32.totalorder %s1188_s6, %s946_s24 }
  0x45   : > { %p943_p3 = pnand %p941_p1, %p927_p12  ;;  %p949_p0 = scmp.lt.s32.totalorder %s947_s30, %s940_s23 }
  0x47   : > { %p944_p6 = pneg %p943_p3  ;;  %p950_p2 = por %p949_p0, %p948_p8 }
  0x49   : > { %p951_p7 = pnand %p950_p2, %p944_p6 }
  0x4b   : > { %954 = shalt.err (!%p951_p7)
}
  0x4c   : > { %s1047_s18 = smov 128   ;;  %p1341_p12 = scmp.ne.s32.totalorder %s1337_s22, 0 }
  0x4d   : > { %799 = dma.hbm_to_vmem [thread:$0]  (!%p1340_p10), %s1183_s5, 4096, %s1188_s6, %s1190_s16, %s1047_s18, %s1044_s8, %s1045_s15  }
  0x4e   : > { %167 = sbr.rel (%p1341_p12) target bundleno = 382 (0x17e), region = 28  ;;  %p1342_p5 = scmp.ne.s32.totalorder (!%p1341_p12), %s1332_s17, 0 }
  0x55   : > { %1008 = dma.done.wait (%p1342_p5), [#allocation3], 256  }
  0x56   : > { %1010 = vsyncadd (%p1342_p5), [#allocation3], 4294967040  ;;  %s1227_s3 = sand.u32 1, %s1025_s10   ;;  %p1343_p10 = scmp.ne.s32.totalorder %s1334_s19, 0 }
  0x57   : > { %s701_s26 = sshll.u32 %s1227_s3, 8  ;;  %s174_s25 = scalar_lea.sflag [#allocation6], %s1227_s3 }
  0x58   : > { %s1231_s29 = scalar_lea.vmem [#allocation5], %s701_s26 }
  0x59   : > { %1012 = dma.done.wait (%p1343_p10), %s174_s25, 4096  }
  0x5a   : > { %1014 = vsyncadd (%p1343_p10), %s174_s25, 4294963200  ;;  %v861_v0 = vld [vmem:[%s1231_s29 + $0x40] sm:$0xff]   ;;  %v865_v4 = vld [vmem:[%s1231_s29 + $0x48] sm:$0xff]   ;;  %v1048_v28 = vmov 1983009808   ;;  %v217_v30 = vlaneseq  ;;  %s702_s17 = sshll.u32 %s1227_s3, 1 }
  0x5b   : > { %v862_v1 = vld [vmem:[%s1231_s29 + $0xc0] sm:$0xff]   ;;  %740 = vmatprep.subr.bf16.mxu0 %v861_v0  ;;  %v866_v5 = vld [vmem:[%s1231_s29 + $0xc8] sm:$0xff]   ;;  %v869_v8 = vld [vmem:[%s1231_s29 + $0x50] sm:$0xff]   ;;  %v215_v29 = vunpack.c.l.s4 %v1048_v28  ;;  %s737_s19 = sshll.u32 %s1033_s12, 5  ;;  %s197_s22 = scalar_lea.vmem [#allocation7], %s702_s17 }
  0x5c   : > { %v863_v2 = vld [vmem:[%s1231_s29] sm:$0xff]   ;;  %762 = vmatprep.subr.bf16.mxu1 %v862_v1  ;;  %v867_v6 = vld [vmem:[%s1231_s29 + $0x8] sm:$0xff]   ;;  %v870_v9 = vld [vmem:[%s1231_s29 + $0xd0] sm:$0xff]   ;;  %v218_v36 = vshrl.u32 %v217_v30, 7  ;;  %s598_s8 = sshll.u32 %s197_s22, 4  ;;  %s1274_s6 = scalar_lea.hbm %s1325_s2, %s737_s19  ;;  %s1276_s8 = int_to_ptr.vmem [resolvable:$true] %s598_s8 }
  0x5d   : > { %v864_v3 = vld [vmem:[%s1231_s29 + $0x80] sm:$0xff]   ;;  %741 = vmatpush3.bf16.msra.mxu0 %v863_v2  ;;  %v868_v7 = vld [vmem:[%s1231_s29 + $0x88] sm:$0xff]   ;;  %v871_v10 = vld [vmem:[%s1231_s29 + $0x10] sm:$0xff]   ;;  %v216_v35 = vunpack.c.0.s8 %v215_v29  ;;  %s583_s16 = scalar_lea.sflag [#allocation4], %s1227_s3  ;;  %s955_s4 = scalar_lea.vmem %s1276_s8, 32 }
  0x5e   : > { %763 = vmatpush3.bf16.msra.mxu1 %v864_v3  ;;  %742 = vmatprep.subr.bf16.mxu0 %v865_v4  ;;  %v872_v11 = vld [vmem:[%s1231_s29 + $0x90] sm:$0xff]   ;;  %v873_v12 = vld [vmem:[%s1231_s29 + $0x58] sm:$0xff]   ;;  %v877_v16 = vld [vmem:[%s1231_s29 + $0x60] sm:$0xff]   ;;  %p956_p9 = scmp.ne.s32.totalorder %s1276_s8, %s955_s4  ;;  %p1344_p11 = scmp.ne.s32.totalorder %s1335_s20, 0 }
  0x5f   : > { %764 = vmatprep.subr.bf16.mxu1 %v866_v5  ;;  %v874_v13 = vld [vmem:[%s1231_s29 + $0xd8] sm:$0xff]   ;;  %v878_v17 = vld [vmem:[%s1231_s29 + $0xe0] sm:$0xff]   ;;  %v881_v20 = vld [vmem:[%s1231_s29 + $0x68] sm:$0xff]   ;;  %v219_v44 = vsub.s32 %v216_v35, %v218_v36  ;;  %s1049_s12 = smov [#allocation7]  }
  0x60   : > { %v875_v14 = vld [vmem:[%s1231_s29 + $0x18] sm:$0xff]   ;;  %v879_v18 = vld [vmem:[%s1231_s29 + $0x20] sm:$0xff]   ;;  %v882_v21 = vld [vmem:[%s1231_s29 + $0xe8] sm:$0xff]   ;;  %p957_p13 = pnand %p956_p9, %p1344_p11  ;;  %s959_s23 = sshll.u32 %s1049_s12, 4  ;;  %s960_s23 = int_to_ptr.vmem [resolvable:$false] %s959_s23 }
  0x61   : > { %743 = vmatpush3.bf16.msra.mxu0 %v867_v6  ;;  %v876_v15 = vld [vmem:[%s1231_s29 + $0x98] sm:$0xff]   ;;  %v880_v19 = vld [vmem:[%s1231_s29 + $0xa0] sm:$0xff]   ;;  %v883_v22 = vld [vmem:[%s1231_s29 + $0x28] sm:$0xff]   ;;  %s961_s28 = scalar_lea.vmem %s960_s23, 64  ;;  %p962_p1 = scmp.lt.s32.totalorder %s1276_s8, %s960_s23 }
  0x62   : > { %765 = vmatpush3.bf16.msra.mxu1 %v868_v7  ;;  %744 = vmatprep.subr.bf16.mxu0 %v869_v8  ;;  %v884_v23 = vld [vmem:[%s1231_s29 + $0xa8] sm:$0xff]   ;;  %v885_v24 = vld [vmem:[%s1231_s29 + $0x70] sm:$0xff]   ;;  %v889_v31 = vld [vmem:[%s1231_s29 + $0x78] sm:$0xff]   ;;  %p958_p4 = pneg %p957_p13  ;;  %p963_p3 = scmp.lt.s32.totalorder %s961_s28, %s955_s4 }
  0x63   : > { %766 = vmatprep.subr.bf16.mxu1 %v870_v9  ;;  %v886_v25 = vld [vmem:[%s1231_s29 + $0xf0] sm:$0xff]   ;;  %v890_v32 = vld [vmem:[%s1231_s29 + $0xf8] sm:$0xff]  }
  0x64   : > { %v887_v26 = vld [vmem:[%s1231_s29 + $0x30] sm:$0xff]   ;;  %v891_v33 = vld [vmem:[%s1231_s29 + $0x38] sm:$0xff]   ;;  %p964_p6 = por %p963_p3, %p962_p1 }
  0x65   : > { %745 = vmatpush3.bf16.msra.mxu0 %v871_v10  ;;  %v888_v27 = vld [vmem:[%s1231_s29 + $0xb0] sm:$0xff]   ;;  %v892_v34 = vld [vmem:[%s1231_s29 + $0xb8] sm:$0xff]  }
  0x66   : > { %767 = vmatpush3.bf16.msra.mxu1 %v872_v11  ;;  %746 = vmatprep.subr.bf16.mxu0 %v873_v12  ;;  %v199_v37 = vld [vmem:[#allocation2] sm:$0xf]  ;;  %v201_v38 = vld [vmem:[#allocation2 + $0x4] sm:$0xf]  ;;  %v205_v39 = vld [vmem:[#allocation2 + $0x8] sm:$0xf]  ;;  %p965_p8 = pnand %p964_p6, %p958_p4 }
  0x67   : > { %768 = vmatprep.subr.bf16.mxu1 %v874_v13  ;;  %v202_v40 = vadd.f32 %v201_v38, %v199_v37  ;;  %v203_v41 = vmax.f32 %v199_v37, %v201_v38  ;;  %v209_v42 = vld [vmem:[#allocation2 + $0xc] sm:$0xf] }
  0x69   : > { %747 = vmatpush3.bf16.msra.mxu0 %v875_v14  ;;  %v206_v43 = vadd.f32 %v205_v39, %v202_v40  ;;  %v207_v45 = vmax.f32 %v203_v41, %v205_v39 }
  0x6a   : > { %769 = vmatpush3.bf16.msra.mxu1 %v876_v15  ;;  %748 = vmatprep.subr.bf16.mxu0 %v877_v16 }
  0x6b   : > { %770 = vmatprep.subr.bf16.mxu1 %v878_v17  ;;  %v210_v46 = vadd.f32 %v209_v42, %v206_v43  ;;  %v211_v47 = vmax.f32 %v207_v45, %v209_v42 }
  0x6d   : > { %749 = vmatpush3.bf16.msra.mxu0 %v879_v18  ;;  %v212_v48 = vmul.f32 0.25, %v210_v46  ;;  %v231_v49 = vrot.slane %v211_v47, %v219_v44 }
  0x6e   : > { %771 = vmatpush3.bf16.msra.mxu1 %v880_v19  ;;  %750 = vmatprep.subr.bf16.mxu0 %v881_v20 }
  0x6f   : > { %772 = vmatprep.subr.bf16.mxu1 %v882_v21  ;;  %v220_v50 = vrot.slane %v212_v48, %v219_v44  ;;  %v232_v51 = vcombine.high %v231_v49, %v231_v49  ;;  %v237_v52 = vpack.c.bf16 %v231_v49, %v231_v49 }
  0x71   : > { %751 = vmatpush3.bf16.msra.mxu0 %v883_v22  ;;  %v221_v53 = vcombine.high %v220_v50, %v220_v50  ;;  %v238_v54 = vpack.c.bf16 %v232_v51, %v232_v51  ;;  %v235_v55 = vpack.c.bf16 %v220_v50, %v220_v50 }
  0x72   : > { %773 = vmatpush3.bf16.msra.mxu1 %v884_v23  ;;  %752 = vmatprep.subr.bf16.mxu0 %v885_v24 }
  0x73   : > { %774 = vmatprep.subr.bf16.mxu1 %v886_v25  ;;  %v236_v56 = vpack.c.bf16 %v221_v53, %v221_v53  ;;  %567 = vmatprep.mubr.bf16.mxu1 %v238_v54 }
  0x75   : > { %753 = vmatpush3.bf16.msra.mxu0 %v887_v26  ;;  %527 = vmatprep.mubr.bf16.mxu0 %v236_v56 }
  0x76   : > { %775 = vmatpush3.bf16.msra.mxu1 %v888_v27  ;;  %754 = vmatprep.subr.bf16.mxu0 %v889_v31 }
  0x77   : > { %776 = vmatprep.subr.bf16.mxu1 %v890_v32 }
  0x79   : > { %755 = vmatpush3.bf16.msra.mxu0 %v891_v33 }
  0x7a   : > { %777 = vmatpush3.bf16.msra.mxu1 %v892_v34 }
  0x7c   : > { %528 = vmatmul.mubr.bf16.vlgmr.msra.gmra.mrb[0].mxu0 %v235_v55 }
  0x7d   : > { %568 = vmatmul.mubr.bf16.vlgmr.msra.gmra.mrb[0].mxu1 %v237_v52 }
 0x14f   : > { %v756_v59 = vpop.f32.mrb[0].mxu0 }
 0x150   : > { %v778_v57 = vpop.f32.mrb[0].mxu1  ;;  %v757_v62 = vpop.f32.mrb[1].mxu0 }
 0x151   : > { %v779_v58 = vpop.f32.mrb[1].mxu1  ;;  %v758_v0 = vadd.f32 %v757_v62, %v756_v59  ;;  %v759_v1 = vpop.f32.mrb[2].mxu0 }
 0x152   : > { %v780_v60 = vadd.f32 %v779_v58, %v778_v57  ;;  %v781_v61 = vpop.f32.mrb[2].mxu1  ;;  %v760_v2 = vpop.f32.mrb[3].mxu0 }
 0x153   : > { %v782_v63 = vpop.f32.mrb[3].mxu1 }
 0x154   : > { %v570_v3 = vadd.f32 %v780_v60, %v758_v0 }
 0x156   : > { %v735_v4 = vmul.f32 -1.442695, %v570_v3 }
 0x158   : > { %893 = vpow2.f32 %v735_v4 }
 0x162   : > { %v894_v5 = vpop.eup %893 }
 0x163   : > { %v578_v6 = vadd.f32 1.0, %v894_v5 }
 0x165   : > { %895 = vrcp.f32 %v578_v6 }
 0x16f   : > { %v896_v7 = vpop.eup %895 }
 0x170   : > { %581 = vst [vmem:[%s197_s22] sm:$0x3] %v896_v7 }
 0x171   : > { %968 = shalt.err (!%p965_p8)
}
 0x172   : > { %s969_s24 = scalar_lea.hbm %s1274_s6, 32  ;;  %s973_s3 = scalar_lea.hbm %s1325_s2, 64 }
 0x173   : > { %p970_p0 = scmp.ne.s32.totalorder %s1274_s6, %s969_s24  ;;  %p974_p12 = scmp.lt.u32.totalorder %s1274_s6, %s1325_s2 }
 0x174   : > { %p975_p5 = scmp.lt.u32.totalorder %s973_s3, %s969_s24  ;;  %p977_p9 = scmp.lt.u32.totalorder %s969_s24, %s1274_s6 }
 0x175   : > { %p971_p2 = pnand %p970_p0, %p1344_p11 }
 0x176   : > { %p976_p10 = por %p975_p5, %p974_p12 }
 0x177   : > { %p972_p7 = pneg %p971_p2 }
 0x178   : > { %p978_p13 = por %p977_p9, %p976_p10 }
 0x17a   : > { %p979_p4 = pnand %p978_p13, %p972_p7 }
 0x17c   : > { %982 = shalt.err (!%p979_p4)
}
 0x17d   : > { %790 = dma.vmem_to_hbm [thread:$0]  (%p1344_p11), %s1276_s8, 32, %s1274_s6, %s583_s16  }
 0x17e PF: > { %s610_s29 = sand.u32 1, %s1021_s9   ;;  %p1345_p1 = scmp.ne.s32.totalorder %s1336_s21, 0 }
 0x17f   : > { %p1346_p3 = scmp.ge.s32.totalorder %s1041_s14, 2  ;;  %s611_s17 = scalar_lea.sflag [#allocation4], %s610_s29 }
 0x181   : > { %p801_p6 = pnand %p1346_p3, %p1345_p1 }
 0x183   : > { %1016 = dma.done.wait (!%p801_p6), %s611_s17, 32  }
 0x184   : > { %1018 = vsyncadd (!%p801_p6), %s611_s17, 4294967264  ;;  %s19_s14 = sadd.s32 1, %s1041_s14   ;;  %s1347_s9 = smov %s1025_s10 }
 0x185   : > { %p16_p8 = scmp.ge.s32.totalorder %s19_s14, 4   ;;  %s1348_s10 = smov %s1029_s11 }
 0x186   : > { %s1349_s11 = smov %s1186_s7  ;;  %s1350_s12 = smov %s1037_s13 }
 0x187   : > { %s1351_s13 = smov %s1353_s27  ;;  %18 = sbr.rel (!%p16_p8) target bundleno = 7 (0x7), region = 82 }
 0x18e   :  { %616 = vsyncpa [#allocation3], 1 }
 0x18f   :  { %618 = vsyncpa [#allocation3 + $0x1], 1 }
 0x190   :  { %619 = vsyncpa [#allocation6], 1 }
 0x191   :  { %621 = vsyncpa [#allocation6 + $0x1], 1 }
 0x192   :  { %622 = vsyncpa [#allocation4], 1 }
 0x193   :  { %624 = vsyncpa [#allocation4 + $0x1], 1 }

</bundles_post_ra>
